<compile_context>
chip_gen: v5e
topology: v5e:2x2
jax: 0.10.0
libtpu: 0.0.40
codegen_flags: <defaults>
</compile_context>

<pallas_src>
import functools

import jax
import jax.numpy as jnp
from jax.experimental import pallas as pl
from jax.experimental.pallas import tpu as pltpu

_VMEM_LIMIT = 48 * 1024 * 1024  # safe on v5e/v6e (128 MiB phys) and below v7x's 64 MiB


def _pick_q_tile(n):
    for c in (512, 256, 128):
        if n % c == 0:
            return c
    return n


# --------------------------------------------------------------------------------------
# Kernel 1: qkv projection (single large dot) + head split, staged to HBM in bf16.
# --------------------------------------------------------------------------------------
def _qkv_kernel(num_heads, x_ref, wqkv_ref, q_ref, k_ref, v_ref):
    x = x_ref[0]                                                    # (N, C) bf16
    N, C = x.shape
    hd = C // num_heads

    # big MXU dot: (N, C) @ (C, 3C), f32 accumulation
    qkv = jnp.dot(x, wqkv_ref[...], preferred_element_type=jnp.float32)
    qkv = qkv.astype(jnp.bfloat16)                                  # (N, 3C)

    # head split (one relayout per tensor, once per batch)
    q_ref[0] = qkv[:, :C].reshape(N, num_heads, hd).transpose(1, 0, 2)
    k_ref[0] = qkv[:, C:2 * C].reshape(N, num_heads, hd).transpose(1, 0, 2)
    v_ref[0] = qkv[:, 2 * C:].reshape(N, num_heads, hd).transpose(1, 0, 2)


# --------------------------------------------------------------------------------------
# Kernel 2: per-(batch, q-tile, head) attention with the output projection fused as a
# reduction over the head axis (head axis is the innermost, "arbitrary" grid dim).
# --------------------------------------------------------------------------------------
def _attn_proj_kernel(q_ref, k_ref, v_ref, wp_ref, bp_ref, o_ref, acc_ref):
    h = pl.program_id(2)

    q = q_ref[0, 0]                                                 # (TQ, hd) bf16
    k = k_ref[0, 0]                                                 # (N,  hd) bf16
    v = v_ref[0, 0]                                                 # (N,  hd) bf16

    # scores (scale already folded into q weights), f32 accumulation on the MXU
    s = jnp.einsum('qd,kd->qk', q, k, preferred_element_type=jnp.float32)   # (TQ, N)
    m = jnp.max(s, axis=-1, keepdims=True)
    p = jnp.exp(s - m)                                              # f32, unnormalized
    l = jnp.sum(p, axis=-1, keepdims=True)                          # (TQ, 1) f32

    o = jnp.dot(p.astype(jnp.bfloat16), v, preferred_element_type=jnp.float32)  # (TQ, hd)
    # deferred softmax normalization on the small (TQ, hd) tensor; EUP reciprocal
    o = o * pl.reciprocal(l, approx=True)

    # fused output projection: this head's contribution, accumulated over the head axis
    contrib = jnp.dot(o.astype(jnp.bfloat16), wp_ref[0],
                      preferred_element_type=jnp.float32)            # (TQ, C) f32

    @pl.when(h == 0)
    def _():
        acc_ref[...] = jnp.broadcast_to(bp_ref[...], acc_ref.shape)  # bias once

    acc_ref[...] += contrib

    @pl.when(h == pl.num_programs(2) - 1)
    def _():
        o_ref[0] = acc_ref[...].astype(o_ref.dtype)


def attention_forward(x, wqkv, wproj, bproj, num_heads, qk_scale=None):
    """x: (B, N, C); wqkv: (3C, C) torch layout; wproj: (C, C) torch layout; bproj: (C,)."""
    B, N, C = x.shape
    assert C % num_heads == 0
    hd = C // num_heads
    scale = (hd ** -0.5) if qk_scale is None else qk_scale

    # ---- one-time host-side prep (outside the grid loop) ----
    wqkv_t = wqkv.T                                    # (C, 3C)  = (in, out)
    wqkv_t = wqkv_t.at[:, :C].multiply(scale)          # fold attention scale into q cols
    wqkv_bf = wqkv_t.astype(jnp.bfloat16)
    wproj_h = wproj.T.reshape(num_heads, hd, C).astype(jnp.bfloat16)   # per-head (hd, C)
    bproj2 = bproj.reshape(1, C).astype(jnp.float32)
    x_bf = x.astype(jnp.bfloat16)

    # ---------------- kernel 1: qkv projection + head split ----------------
    flops1 = 2 * B * N * C * 3 * C
    bytes1 = 2 * (B * N * C) + 2 * (C * 3 * C) + 2 * (3 * B * N * C)

    qh, kh, vh = pl.pallas_call(
        functools.partial(_qkv_kernel, num_heads),
        out_shape=(
            jax.ShapeDtypeStruct((B, num_heads, N, hd), jnp.bfloat16),
            jax.ShapeDtypeStruct((B, num_heads, N, hd), jnp.bfloat16),
            jax.ShapeDtypeStruct((B, num_heads, N, hd), jnp.bfloat16),
        ),
        grid=(B,),
        in_specs=[
            pl.BlockSpec((1, N, C), lambda b: (b, 0, 0)),                      # x
            pl.BlockSpec((C, 3 * C), lambda b: (0, 0),
                         pipeline_mode=pl.Buffered(1)),                        # qkv weight
        ],
        out_specs=(
            pl.BlockSpec((1, num_heads, N, hd), lambda b: (b, 0, 0, 0)),
            pl.BlockSpec((1, num_heads, N, hd), lambda b: (b, 0, 0, 0)),
            pl.BlockSpec((1, num_heads, N, hd), lambda b: (b, 0, 0, 0)),
        ),
        compiler_params=pltpu.CompilerParams(
            dimension_semantics=("parallel",),
            vmem_limit_bytes=_VMEM_LIMIT,
        ),
        cost_estimate=pl.CostEstimate(
            flops=flops1, transcendentals=0, bytes_accessed=bytes1),
    )(x_bf, wqkv_bf)

    # ---------------- kernel 2: attention + fused output projection ----------------
    TQ = _pick_q_tile(N)
    nqt = N // TQ

    flops2 = B * (4 * num_heads * N * N * hd + 2 * N * C * C)
    trans2 = B * num_heads * N * N
    bytes2 = 2 * (3 * B * N * C) + 2 * (C * C) + 4 * C + 4 * (B * N * C)

    out = pl.pallas_call(
        _attn_proj_kernel,
        out_shape=jax.ShapeDtypeStruct((B, N, C), x.dtype),
        grid=(B, nqt, num_heads),
        in_specs=[
            pl.BlockSpec((1, 1, TQ, hd), lambda b, t, h: (b, h, t, 0)),        # q tile
            pl.BlockSpec((1, 1, N, hd), lambda b, t, h: (b, h, 0, 0)),         # k (full)
            pl.BlockSpec((1, 1, N, hd), lambda b, t, h: (b, h, 0, 0)),         # v (full)
            pl.BlockSpec((1, hd, C), lambda b, t, h: (h, 0, 0)),               # proj W head
            pl.BlockSpec((1, C), lambda b, t, h: (0, 0),
                         pipeline_mode=pl.Buffered(1)),                        # proj bias
        ],
        out_specs=pl.BlockSpec((1, TQ, C), lambda b, t, h: (b, t, 0)),
        scratch_shapes=[pltpu.VMEM((TQ, C), jnp.float32)],
        compiler_params=pltpu.CompilerParams(
            dimension_semantics=("parallel", "parallel", "arbitrary"),
            vmem_limit_bytes=_VMEM_LIMIT,
        ),
        cost_estimate=pl.CostEstimate(
            flops=flops2, transcendentals=trans2, bytes_accessed=bytes2),
    )(qh, kh, vh, wproj_h, bproj2)

    return out


def _reference_attention(x, wqkv, wproj, bproj, num_heads, qk_scale=None):
    """Pure-JAX (f32) mirror of the PyTorch Attention.forward (eval mode)."""
    B, N, C = x.shape
    hd = C // num_heads
    scale = (hd ** -0.5) if qk_scale is None else qk_scale
    qkv = jnp.einsum('bnc,oc->bno', x, wqkv)                       # Linear, bias=False
    qkv = qkv.reshape(B, N, 3, num_heads, hd).transpose(2, 0, 3, 1, 4)
    q, k, v = qkv[0], qkv[1], qkv[2]                               # (B, H, N, hd)
    attn = jnp.einsum('bhnd,bhmd->bhnm', q, k) * scale
    attn = jax.nn.softmax(attn, axis=-1)
    o = jnp.einsum('bhnm,bhmd->bhnd', attn, v)
    o = o.transpose(0, 2, 1, 3).reshape(B, N, C)
    return jnp.einsum('bnc,oc->bno', o, wproj) + bproj             # proj Linear + bias


if __name__ == "__main__":
    B, N, dim, heads = 2, 8, 32, 4
    key = jax.random.PRNGKey(0)
    kx, kqkv, kproj, kb = jax.random.split(key, 4)

    def kaiming(k, shape):  # (out_features, in_features), fan_in mode
        std = (2.0 / shape[1]) ** 0.5
        return std * jax.random.normal(k, shape, jnp.float32)

    x = jax.random.normal(kx, (B, N, dim), jnp.float32)
    wqkv = kaiming(kqkv, (3 * dim, dim))          # qkv_bias=False
    wproj = kaiming(kproj, (dim, dim))
    bproj = 0.1 * jax.random.normal(kb, (dim,), jnp.float32)

    out = attention_forward(x, wqkv, wproj, bproj, heads)
    out = jax.block_until_ready(out)

    ref = _reference_attention(x, wqkv, wproj, bproj, heads)
    assert out.shape == (B, N, dim)
    # bf16 MXU operands + approx reciprocal => looser tolerance vs f32 reference
    assert jnp.allclose(out, ref, atol=5e-2, rtol=5e-2), "mismatch vs reference"

    print("KERNEL_OK")
</pallas_src>

<mosaic_0001>
module attributes {stable_mosaic.version = 11 : i64} {
  func.func @_qkv_kernel(%arg0: i32, %arg1: memref<1x8x32xbf16, #tpu.memory_space<vmem>>, %arg2: memref<32x96xbf16, #tpu.memory_space<vmem>>, %arg3: memref<1x4x8x8xbf16, #tpu.memory_space<vmem>>, %arg4: memref<1x4x8x8xbf16, #tpu.memory_space<vmem>>, %arg5: memref<1x4x8x8xbf16, #tpu.memory_space<vmem>>) attributes {dimension_semantics = [#tpu.dimension_semantics<parallel>], iteration_bounds = array<i64: 2>, scalar_prefetch = 0 : i64, scratch_operands = 0 : i64, tpu.core_type = #tpu.core_type<tc>, window_params = [{transform_indices = @transform_0, window_bounds = array<i64: 1, 8, 32>}, {pipeline_mode = #tpu.pipeline_mode<synchronous>, transform_indices = @transform_1, window_bounds = array<i64: 32, 96>}, {transform_indices = @transform_2, window_bounds = array<i64: 1, 4, 8, 8>}, {transform_indices = @transform_3, window_bounds = array<i64: 1, 4, 8, 8>}, {transform_indices = @transform_4, window_bounds = array<i64: 1, 4, 8, 8>}]} {
    %c0 = arith.constant 0 : index
    %c0_0 = arith.constant 0 : index
    %c0_1 = arith.constant 0 : index
    %0 = vector.load %arg1[%c0, %c0_0, %c0_1] : memref<1x8x32xbf16, #tpu.memory_space<vmem>>, vector<1x8x32xbf16>
    %1 = vector.shape_cast %0 : vector<1x8x32xbf16> to vector<8x32xbf16>
    %c0_2 = arith.constant 0 : index
    %c0_3 = arith.constant 0 : index
    %2 = vector.load %arg2[%c0_2, %c0_3] : memref<32x96xbf16, #tpu.memory_space<vmem>>, vector<32x96xbf16>
    %cst = arith.constant dense<0.000000e+00> : vector<8x96xf32>
    %3 = tpu.matmul %1, %2, %cst {dimension_numbers = #tpu.dot_dimension_numbers<[1], [0], [0], [1], [0, 0, 1, 1], [], []>} : vector<8x32xbf16>, vector<32x96xbf16>, vector<8x96xf32> -> vector<8x96xf32>
    %4 = arith.truncf %3 : vector<8x96xf32> to vector<8x96xbf16>
    %5 = vector.extract_strided_slice %4 {offsets = [0, 0], sizes = [8, 32], strides = [1, 1]} : vector<8x96xbf16> to vector<8x32xbf16>
    %6 = vector.shape_cast %5 : vector<8x32xbf16> to vector<8x4x8xbf16>
    %7 = tpu.transpose %6, [1, 0, 2] : vector<8x4x8xbf16> -> vector<4x8x8xbf16>
    %c0_4 = arith.constant 0 : index
    %c0_5 = arith.constant 0 : index
    %c0_6 = arith.constant 0 : index
    %c0_7 = arith.constant 0 : index
    %8 = vector.load %arg3[%c0_4, %c0_5, %c0_6, %c0_7] : memref<1x4x8x8xbf16, #tpu.memory_space<vmem>>, vector<1x4x8x8xbf16>
    %9 = vector.shape_cast %8 : vector<1x4x8x8xbf16> to vector<4x8x8xbf16>
    %10 = vector.shape_cast %7 : vector<4x8x8xbf16> to vector<1x4x8x8xbf16>
    tpu.vector_store %arg3[%c0_4, %c0_5, %c0_6, %c0_7], %10 {strides = array<i32>} : memref<1x4x8x8xbf16, #tpu.memory_space<vmem>>, vector<1x4x8x8xbf16>,
    %11 = vector.extract_strided_slice %4 {offsets = [0, 32], sizes = [8, 32], strides = [1, 1]} : vector<8x96xbf16> to vector<8x32xbf16>
    %12 = vector.shape_cast %11 : vector<8x32xbf16> to vector<8x4x8xbf16>
    %13 = tpu.transpose %12, [1, 0, 2] : vector<8x4x8xbf16> -> vector<4x8x8xbf16>
    %c0_8 = arith.constant 0 : index
    %c0_9 = arith.constant 0 : index
    %c0_10 = arith.constant 0 : index
    %c0_11 = arith.constant 0 : index
    %14 = vector.load %arg4[%c0_8, %c0_9, %c0_10, %c0_11] : memref<1x4x8x8xbf16, #tpu.memory_space<vmem>>, vector<1x4x8x8xbf16>
    %15 = vector.shape_cast %14 : vector<1x4x8x8xbf16> to vector<4x8x8xbf16>
    %16 = vector.shape_cast %13 : vector<4x8x8xbf16> to vector<1x4x8x8xbf16>
    tpu.vector_store %arg4[%c0_8, %c0_9, %c0_10, %c0_11], %16 {strides = array<i32>} : memref<1x4x8x8xbf16, #tpu.memory_space<vmem>>, vector<1x4x8x8xbf16>,
    %17 = vector.extract_strided_slice %4 {offsets = [0, 64], sizes = [8, 32], strides = [1, 1]} : vector<8x96xbf16> to vector<8x32xbf16>
    %18 = vector.shape_cast %17 : vector<8x32xbf16> to vector<8x4x8xbf16>
    %19 = tpu.transpose %18, [1, 0, 2] : vector<8x4x8xbf16> -> vector<4x8x8xbf16>
    %c0_12 = arith.constant 0 : index
    %c0_13 = arith.constant 0 : index
    %c0_14 = arith.constant 0 : index
    %c0_15 = arith.constant 0 : index
    %20 = vector.load %arg5[%c0_12, %c0_13, %c0_14, %c0_15] : memref<1x4x8x8xbf16, #tpu.memory_space<vmem>>, vector<1x4x8x8xbf16>
    %21 = vector.shape_cast %20 : vector<1x4x8x8xbf16> to vector<4x8x8xbf16>
    %22 = vector.shape_cast %19 : vector<4x8x8xbf16> to vector<1x4x8x8xbf16>
    tpu.vector_store %arg5[%c0_12, %c0_13, %c0_14, %c0_15], %22 {strides = array<i32>} : memref<1x4x8x8xbf16, #tpu.memory_space<vmem>>, vector<1x4x8x8xbf16>,
    return
  }
  func.func @transform_0(%arg0: i32) -> (i32, i32, i32) {
    %c0_i32 = arith.constant 0 : i32
    %c0_i32_0 = arith.constant 0 : i32
    %c0_i32_1 = arith.constant 0 : i32
    return %arg0, %c0_i32, %c0_i32_0 : i32, i32, i32
  }
  func.func @transform_1(%arg0: i32) -> (i32, i32) {
    %c0_i32 = arith.constant 0 : i32
    %c0_i32_0 = arith.constant 0 : i32
    %c0_i32_1 = arith.constant 0 : i32
    return %c0_i32, %c0_i32_0 : i32, i32
  }
  func.func @transform_2(%arg0: i32) -> (i32, i32, i32, i32) {
    %c0_i32 = arith.constant 0 : i32
    %c0_i32_0 = arith.constant 0 : i32
    %c0_i32_1 = arith.constant 0 : i32
    %c0_i32_2 = arith.constant 0 : i32
    return %arg0, %c0_i32, %c0_i32_0, %c0_i32_1 : i32, i32, i32, i32
  }
  func.func @transform_3(%arg0: i32) -> (i32, i32, i32, i32) {
    %c0_i32 = arith.constant 0 : i32
    %c0_i32_0 = arith.constant 0 : i32
    %c0_i32_1 = arith.constant 0 : i32
    %c0_i32_2 = arith.constant 0 : i32
    return %arg0, %c0_i32, %c0_i32_0, %c0_i32_1 : i32, i32, i32, i32
  }
  func.func @transform_4(%arg0: i32) -> (i32, i32, i32, i32) {
    %c0_i32 = arith.constant 0 : i32
    %c0_i32_0 = arith.constant 0 : i32
    %c0_i32_1 = arith.constant 0 : i32
    %c0_i32_2 = arith.constant 0 : i32
    return %arg0, %c0_i32, %c0_i32_0, %c0_i32_1 : i32, i32, i32, i32
  }
}

</mosaic_0001>

<bundles_post_ra>
// kernel: tpu_custom_call.1
= control target key start
LH: loop header
LB: loop body
LE: loop exit
PB: predicated region body
PF: predicated region fallthrough
CT: control target
= control target key end

     0   :  { %10 = vsyncpa [#allocation3], 0  ;;  %s1532_s0 = inlined_call_operand.hbm [shape: bf16[2,8,32], index: 0, kind: input, shape index: {}]   ;;  %s1533_s1 = inlined_call_operand.hbm [shape: bf16[32,96], index: 1, kind: input, shape index: {}]   ;;  %s1534_s2 = inlined_call_operand.hbm [shape: bf16[2,4,8,8], index: 2, kind: output, shape index: {0}]   ;;  %s1535_s3 = inlined_call_operand.hbm [shape: bf16[2,4,8,8], index: 3, kind: output, shape index: {1}]   ;;  %s1536_s4 = inlined_call_operand.hbm [shape: bf16[2,4,8,8], index: 4, kind: output, shape index: {2}]  }
   0x1   :  { %12 = vsyncpa [#allocation3 + $0x1], 0 }
   0x2   :  { %13 = vsyncpa [#allocation6], 0 }
   0x3   :  { %14 = vsyncpa [#allocation4], 0 }
   0x4   :  { %16 = vsyncpa [#allocation4 + $0x1], 0 }
   0x5   :  { %17 = vsyncpa [#allocation9], 0 }
   0x6   :  { %19 = vsyncpa [#allocation9 + $0x1], 0  ;;  %s1225_s15 = smov 0   ;;  %s1227_s16 = smov 0  }
   0x7   :  { %s1229_s17 = smov 0   ;;  %s1231_s18 = smov 0  }
   0x8 LB: > { %s166_s21 = sshll.u32 %s1533_s1, 4  ;;  %s1249_s22 = sadd.s32 4294967295, %s1187_s18   ;;  %s1187_s18 = sphi %s1231_s18, %s1551_s18   ;;  %s1183_s17 = sphi %s1229_s17, %s1550_s17   ;;  %s1179_s16 = sphi %s1227_s16, %s1549_s16   ;;  %s1175_s15 = sphi %s1225_s15, %s1548_s15   ;;  %s167_s21 = int_to_ptr.hbm [resolvable:$true] %s166_s21 }
   0x9   : > { %p884_p0 = scmp.ge.s32.totalorder %s1187_s18, 1  ;;  %p46_p1 = scmp.eq.s32.totalorder %s1249_s22, 0 }
   0xa   : > { %p155_p2 = scmp.lt.s32.totalorder %s1187_s18, 3  ;;  %s1189_s24 = smov [#allocation5]  }
   0xb   : > { %s168_s25 = sshll.u32 %s1189_s24, 4  ;;  %s1190_s26 = smov 64   ;;  %s169_s25 = int_to_ptr.vmem [resolvable:$true] %s168_s25 }
   0xc   : > { %p1254_p3 = pnand %p884_p0, %p155_p2  ;;  %s1191_s27 = smov 4  }
   0xd   : > { %s1537_s28 = sadd.s32 4294967294, %s1187_s18   ;;  %s1265_s29 = sadd.s32 1, %s1187_s18  }
   0xe   : > { %p932_p4 = pneg %p1254_p3  ;;  %s32_s30 = sadd.s32 1, %s1183_s17 }
   0xf   : > { %s29_s5 = ssub.s32 %s1187_s18, %s1265_s29  ;;  %p39_p7 = scmp.ne.s32.totalorder %s1183_s17, %s1179_s16 }
  0x10   : > { %p933_p6 = pnand %p932_p4, %p46_p1  ;;  %p30_p8 = scmp.eq.s32.totalorder %s29_s5, 0 }
  0x11   : > { %p40_p9 = scmp.eq.s32.totalorder %s1187_s18, 0  ;;  %p45_p10 = scmp.ne.s32.totalorder %s1179_s16, %s1175_s15 }
  0x12   : > { %935 = dma.hbm_to_vmem [thread:$0]  (!%p933_p6), %s167_s21, 256, %s169_s25, [#allocation6], %s1190_s26, %s1190_s26, %s1191_s27  }
  0x13   : > { %p90_p11 = scmp.eq.s32.totalorder %s1249_s22, 1  ;;  %p1281_p12 = por %p46_p1, %p45_p10 }
  0x14   : > { %s1277_s6 = scalar_select %p30_p8, %s1183_s17, %s32_s30  }
  0x15   : > { %p1285_p13 = por %p90_p11, %p39_p7  ;;  %p96_p0 = scmp.eq.s32.totalorder %s1537_s28, 1 }
  0x16   : > { %p41_p2 = por %p40_p9, %p39_p7  ;;  %s182_s9 = sand.u32 1, %s1183_s17  }
  0x17   : > { %p1292_p4 = por %p96_p0, %p45_p10  ;;  %p951_p6 = scmp.lt.s32.totalorder %s1187_s18, 2 }
  0x18   : > { %s887_s11 = sshll.u32 %s182_s9, 2  ;;  %s888_s12 = sshll.u32 %s1187_s18, 2 }
  0x19   : > { %s190_s19 = scalar_lea.hbm %s1532_s0, %s888_s12  ;;  %s186_s21 = scalar_lea.vmem [#allocation2], %s887_s11 }
  0x1a   : > { %s192_s20 = sshll.u32 %s190_s19, 4  ;;  %s194_s24 = sshll.u32 %s186_s21, 4  ;;  %s193_s20 = int_to_ptr.hbm [resolvable:$true] %s192_s20  ;;  %s195_s24 = int_to_ptr.vmem [resolvable:$true] %s194_s24 }
  0x1b   : > { %p1301_p8 = pnand %p951_p6, %p41_p2  ;;  %s183_s26 = scalar_lea.sflag [#allocation3], %s182_s9 }
  0x1c   : > { %s1027_s27 = sshra.s32 %s193_s20, 4  ;;  %s1034_s11 = scalar_lea.hbm %s1532_s0, 8  ;;  %s1028_s27 = int_to_ptr.hbm [resolvable:$true] %s1027_s27 }
  0x1d   : > { %s1029_s30 = scalar_lea.hbm %s1028_s27, 4  ;;  %p1031_p9 = pneg %p1301_p8 }
  0x1e   : > { %p1030_p7 = scmp.ne.s32.totalorder %s1028_s27, %s1029_s30  ;;  %p1035_p0 = scmp.lt.s32.totalorder %s1028_s27, %s1532_s0 }
  0x1f   : > { %p1036_p2 = scmp.lt.s32.totalorder %s1034_s11, %s1029_s30 }
  0x20   : > { %p1032_p10 = pnand %p1031_p9, %p1030_p7 }
  0x21   : > { %p1037_p6 = por %p1036_p2, %p1035_p0 }
  0x22   : > { %p1033_p11 = pneg %p1032_p10 }
  0x24   : > { %p1038_p5 = pnand %p1037_p6, %p1033_p11 }
  0x26   : > { %1041 = shalt.err (!%p1038_p5)
}
  0x27   : > { %939 = dma.hbm_to_vmem [thread:$0]  (!%p1301_p8), %s193_s20, 64, %s195_s24, %s183_s26  }
  0x28   : > { %203 = sbr.rel (%p1254_p3) target bundleno = 470 (0x1d6), region = 28  ;;  %s1318_s9 = sand.u32 (!%p1254_p3), 1, %s1179_s16  }
  0x29   : > { %s890_s19 = sshll.u32 (!%p1254_p3), %s1318_s9, 2  ;;  %s206_s21 = scalar_lea.sflag (!%p1254_p3), [#allocation3], %s1318_s9 }
  0x2a   : > { %s209_s5 = scalar_lea.vmem (!%p1254_p3), [#allocation2], %s890_s19 }
  0x2d   : > { %1158 = dma.done.wait (%p1281_p12), %s206_s21, 64  }
  0x2e   : > { %1160 = vsyncadd (%p1281_p12), %s206_s21, 4294967232 }
  0x2f   : > { %1162 = dma.done.wait (%p46_p1), [#allocation6], 256  }
  0x30   : > { %1164 = vsyncadd (%p46_p1), [#allocation6], 4294967040  ;;  %v916_v0 = vld [vmem:[#allocation5 + $0x8] sm:$0xff]  ;;  %v915_v1 = vld [vmem:[#allocation5] sm:$0xff]  ;;  %vm268_vm0 = vcmask 261120   ;;  %s1538_s23 = smov 64  }
  0x31   : > { %278 = vmatpush.bf16.msra.mxu0 %v916_v0  ;;  %v251_v2 = vld [vmem:[%s209_s5] sm:$0xf]  ;;  %s1193_s7 = smov 104   ;;  %s1194_s20 = smov 120   ;;  %v1197_v6 = vmov 1983009808  }
  0x32   : > { %s1195_s24 = smov 96   ;;  %s1196_s25 = smov 112   ;;  %v307_v7 = vunpack.c.l.s4 %v1197_v6  ;;  %v1198_v15 = vmov 1934713408   ;;  %vm316_vm1 = vcmask 1047556   ;;  %vm412_vm2 = vcmask 60416  }
  0x33   : > { %v321_v16 = vunpack.c.l.s4 %v1198_v15  ;;  %s1365_s26 = sshll.u32 %s1318_s9, 4  ;;  %s1376_s30 = sshll.u32 %s1249_s22, 4 }
  0x34   : > { %v1332_v10 = vunpack.c.0.s8 %v307_v7  ;;  %s235_s27 = scalar_lea.vmem [#allocation7], %s1365_s26  ;;  %s699_s13 = scalar_lea.hbm %s1534_s2, %s1376_s30 }
  0x35   : > { %279 = vmatpush.bf16.msra.mxu0 %v915_v1  ;;  %v1337_v23 = vunpack.c.0.s8 %v321_v16  ;;  %s700_s14 = sshll.u32 %s235_s27, 4  ;;  %s702_s19 = sshll.u32 %s699_s13, 4  ;;  %s701_s14 = int_to_ptr.vmem [resolvable:$true] %s700_s14  ;;  %s703_s19 = int_to_ptr.hbm [resolvable:$true] %s702_s19 }
  0x36   : > { %s678_s21 = scalar_lea.sflag [#allocation4], %s1318_s9  ;;  %s1071_s5 = sshra.s32 %s703_s19, 4  ;;  %s1072_s5 = int_to_ptr.hbm [resolvable:$true] %s1071_s5 }
  0x37   : > { %p1078_p12 = scmp.lt.s32.totalorder %s1072_s5, %s1534_s2 }
  0x38   : > { %903 = vmatmul.msk.bf16.vlgmr.msra.gmra.mxu0 %vm268_vm0, %v251_v2 }
  0xb5   : > { %v281_v3 = vpop.f32.mrf.mxu0 }
  0xb6   : > { %v285_v4 = vpack.c.bf16 %v281_v3, %v281_v3 }
  0xb8   : > { %547 = vrot.lane.b32.xlu2 %v285_v4, %s1538_s23  ;;  %291 = vrot.lane.b32.xlu1 %v285_v4, %s1193_s7  ;;  %v296_v12 = vshrl.u32 %v285_v4, 16  ;;  %s1073_s7 = scalar_lea.hbm %s1072_s5, 16 }
  0xb9   : > { %287 = vrot.lane.b32.xlu0 %v285_v4, %s1194_s20  ;;  %p1074_p1 = scmp.ne.s32.totalorder %s1072_s5, %s1073_s7 }
  0xbb   : > { %p1075_p3 = pnand %p1074_p1, %p1285_p13 }
  0xbd   : > { %v283_v5 = vpop.f32.mrf.mxu0  ;;  %p1076_p5 = pneg %p1075_p3 }
  0xc0   : > { %417 = vrot.lane.b32.xlu1 %v285_v4, %s1195_s24 }
  0xc1   : > { %289 = vrot.lane.b32.xlu0 %v285_v4, %s1196_s25  ;;  %s1077_s25 = scalar_lea.hbm %s1534_s2, 32 }
  0xc2   : > { %p1079_p8 = scmp.lt.s32.totalorder %s1077_s25, %s1073_s7 }
  0xc4   : > { %p1080_p7 = por %p1079_p8, %p1078_p12 }
  0xc6   : > { %p1081_p9 = pnand %p1080_p7, %p1076_p5 }
 0x12a   : > { %v292_v14 = vpop.permute.xlu1 %291 }
 0x12b   : > { %v288_v8 = vpop.permute.xlu0 %287  ;;  %v303_v19 = vshrl.u32 %v292_v14, 16 }
 0x12c   : > { %v297_v9 = vshrl.u32 %v288_v8, 16  ;;  %549 = vrot.lane.b32.xlu0 %v288_v8, %s1538_s23  ;;  %419 = vrot.lane.b32.xlu2 %v288_v8, %s1195_s24  ;;  %v295_v11 = vpack.i.b16 %v288_v8, %v285_v4 }
 0x12e   : > { %v298_v13 = vpack.i.b16 %v297_v9, %v296_v12  ;;  %v309_v17 = vperm.slane %v295_v11, %v1332_v10 }
 0x130   : > { %v336_v20 = vperm.slane %v298_v13, %v1332_v10  ;;  %v318_v24 = vrot.slane %v309_v17, 4 }
 0x132   : > { %v344_v27 = vrot.slane %v336_v20, 4 }
 0x133   : > { %v290_v18 = vpop.permute.xlu0 %289 }
 0x134   : > { %v301_v21 = vpack.i.b16 %v292_v14, %v290_v18  ;;  %v302_v22 = vshrl.u32 %v290_v18, 16  ;;  %423 = vrot.lane.b32.xlu2 %v292_v14, %s1195_s24  ;;  %551 = vrot.lane.b32.xlu0 %v290_v18, %s1538_s23 }
 0x135   : > { %421 = vrot.lane.b32.xlu1 %v290_v18, %s1195_s24 }
 0x136   : > { %v304_v25 = vpack.i.b16 %v303_v19, %v302_v22  ;;  %v314_v26 = vperm.slane %v301_v21, %v1332_v10 }
 0x138   : > { %v315_v28 = vrot.slane %v314_v26, 4  ;;  %v319_v29 = vsel %vm316_vm1, %v314_v26, %v318_v24  ;;  %v341_v30 = vperm.slane %v304_v25, %v1332_v10 }
 0x139   : > { %v327_v31 = vperm.slane %v319_v29, %v1337_v23 }
 0x13a   : > { %v317_v32 = vsel %vm316_vm1, %v315_v28, %v309_v17  ;;  %v342_v33 = vrot.slane %v341_v30, 4  ;;  %v345_v34 = vsel %vm316_vm1, %v341_v30, %v344_v27 }
 0x13b   : > { %v323_v35 = vperm.slane %v317_v32, %v1337_v23  ;;  %v330_v36 = vrot.slane %v327_v31, 4  ;;  %v353_v37 = vperm.slane %v345_v34, %v1337_v23 }
 0x13c   : > { %v343_v38 = vsel %vm316_vm1, %v342_v33, %v336_v20 }
 0x13d   : > { %v328_v39 = vrot.slane %v323_v35, 4  ;;  %v331_v40 = vsel %vm316_vm1, 0, %v330_v36  ;;  %v349_v41 = vperm.slane %v343_v38, %v1337_v23  ;;  %v356_v42 = vrot.slane %v353_v37, 4  ;;  %553 = vrot.lane.b32.xlu1 %v292_v14, %s1538_s23 }
 0x13e   : > { %v363_v43 = vrot.slane %v331_v40, 4  ;;  %v358_v47 = vsel %vm316_vm1, %v330_v36, %v323_v35 }
 0x13f   : > { %v329_v44 = vsel %vm316_vm1, 0, %v328_v39  ;;  %v354_v45 = vrot.slane %v349_v41, 4  ;;  %v357_v46 = vsel %vm316_vm1, 0, %v356_v42  ;;  %v377_v52 = vsel %vm316_vm1, %v356_v42, %v349_v41 }
 0x140   : > { %v364_v48 = vsel %vm316_vm1, %v363_v43, %v329_v44  ;;  %v382_v49 = vrot.slane %v357_v46, 4  ;;  %v362_v54 = vperm.slane %v358_v47, %v1332_v10  ;;  %v381_v58 = vperm.slane %v377_v52, %v1332_v10 }
 0x141   : > { %v355_v50 = vsel %vm316_vm1, 0, %v354_v45  ;;  %v368_v51 = vperm.slane %v364_v48, %v1332_v10 }
 0x142   : > { %v383_v53 = vsel %vm316_vm1, %v382_v49, %v355_v50 }
 0x143   : > { %v369_v55 = vrot.slane %v368_v51, 4  ;;  %v387_v56 = vperm.slane %v383_v53, %v1332_v10 }
 0x145   : > { %v370_v57 = vsel %vm316_vm1, %v369_v55, %v362_v54  ;;  %v388_v59 = vrot.slane %v387_v56, 4 }
 0x146   : > { %v374_v60 = vperm.slane %v370_v57, %v1337_v23 }
 0x147   : > { %v389_v61 = vsel %vm316_vm1, %v388_v59, %v381_v58 }
 0x148   : > { %v375_v62 = vrot.slane %v374_v60, 4  ;;  %v393_v63 = vperm.slane %v389_v61, %v1337_v23  ;;  %v400_v0 = vshrl.u32 %v374_v60, 16 }
 0x14a   : > { %v376_v1 = vsel %vm316_vm1, 0, %v375_v62  ;;  %v394_v2 = vrot.slane %v393_v63, 4  ;;  %v398_v3 = vpack.i.b16 %v393_v63, %v374_v60  ;;  %v401_v4 = vshrl.u32 %v393_v63, 16 }
 0x14b   : > { %v408_v8 = vshrl.u32 %v376_v1, 16 }
 0x14c   : > { %v395_v5 = vsel %vm316_vm1, 0, %v394_v2  ;;  %v402_v6 = vpack.i.b16 %v401_v4, %v400_v0  ;;  %413 = vst.msk [vmem:[%s235_s27] sm:$0xf] %vm412_vm2, %v398_v3 }
 0x14d   : > { %v406_v7 = vpack.i.b16 %v395_v5, %v376_v1  ;;  %v409_v9 = vshrl.u32 %v395_v5, 16 }
 0x14e   : > { %414 = vst.msk [vmem:[%s235_s27 + $0x4] sm:$0xf] %vm412_vm2, %v402_v6 }
 0x14f   : > { %v410_v11 = vpack.i.b16 %v409_v9, %v408_v8  ;;  %415 = vst.msk [vmem:[%s235_s27 + $0x8] sm:$0xf] %vm412_vm2, %v406_v7 }
 0x151   : > { %416 = vst.msk [vmem:[%s235_s27 + $0xc] sm:$0xf] %vm412_vm2, %v410_v11 }
 0x152   : > { %1084 = shalt.err (!%p1081_p9)
}
 0x153   : > { %s1199_s9 = smov 4   ;;  %s1545_s27 = smov 64   ;;  %v548_v12 = vpop.permute.xlu2 %547  ;;  %v418_v14 = vpop.permute.xlu1 %417 }
 0x154   : > { %926 = dma.vmem_to_hbm [thread:$0]  (%p1285_p13), %s701_s14, 256, %s703_s19, %s678_s21, %s1545_s27, %s1545_s27, %s1199_s9   ;;  %v428_v16 = vshrl.u32 %v418_v14, 16  ;;  %v558_v29 = vshrl.u32 %v548_v12, 16 }
 0x155   : > { %s716_s12 = scalar_lea.hbm %s1535_s3, %s1376_s30  ;;  %s682_s11 = sand.u32 1, %s1249_s22  }
 0x156   : > { %s242_s13 = scalar_lea.vmem [#allocation8], %s1365_s26  ;;  %s1453_s19 = sshll.u32 %s716_s12, 4  ;;  %s720_s19 = int_to_ptr.hbm [resolvable:$true] %s1453_s19 }
 0x157   : > { %s717_s14 = sshll.u32 %s242_s13, 4  ;;  %s1466_s22 = scalar_lea.sflag [#allocation9], %s682_s11  ;;  %s718_s14 = int_to_ptr.vmem [resolvable:$true] %s717_s14 }
 0x158   : > { %s1099_s21 = sshra.s32 %s720_s19, 4  ;;  %s1105_s24 = scalar_lea.hbm %s1535_s3, 32  ;;  %s1100_s21 = int_to_ptr.hbm [resolvable:$true] %s1099_s21 }
 0x159   : > { %s1101_s5 = scalar_lea.hbm %s1100_s21, 16  ;;  %p1106_p2 = scmp.lt.s32.totalorder %s1100_s21, %s1535_s3 }
 0x15a   : > { %p1102_p10 = scmp.ne.s32.totalorder %s1100_s21, %s1101_s5  ;;  %p1107_p6 = scmp.lt.s32.totalorder %s1105_s24, %s1101_s5 }
 0x15c   : > { %p1103_p11 = pnand %p1102_p10, %p1285_p13  ;;  %p1108_p1 = por %p1107_p6, %p1106_p2 }
 0x15e   : > { %p1104_p0 = pneg %p1103_p11 }
 0x160   : > { %p1109_p3 = pnand %p1108_p1, %p1104_p0 }
 0x186   : > { %v420_v13 = vpop.permute.xlu2 %419 }
 0x187   : > { %v429_v15 = vshrl.u32 %v420_v13, 16  ;;  %v427_v17 = vpack.i.b16 %v420_v13, %v418_v14 }
 0x189   : > { %v430_v19 = vpack.i.b16 %v429_v15, %v428_v16  ;;  %v441_v21 = vperm.slane %v427_v17, %v1332_v10 }
 0x18b   : > { %v467_v25 = vperm.slane %v430_v19, %v1332_v10  ;;  %v449_v30 = vrot.slane %v441_v21, 4 }
 0x18d   : > { %v475_v35 = vrot.slane %v467_v25, 4 }
 0x18e   : > { %v424_v20 = vpop.permute.xlu2 %423 }
 0x18f   : > { %v435_v26 = vshrl.u32 %v424_v20, 16 }
 0x19e   : > { %v550_v18 = vpop.permute.xlu0 %549 }
 0x19f   : > { %v559_v22 = vshrl.u32 %v550_v18, 16  ;;  %v557_v31 = vpack.i.b16 %v550_v18, %v548_v12 }
 0x1a1   : > { %v560_v34 = vpack.i.b16 %v559_v22, %v558_v29  ;;  %v571_v41 = vperm.slane %v557_v31, %v1332_v10 }
 0x1a3   : > { %v597_v45 = vperm.slane %v560_v34, %v1332_v10  ;;  %v579_v58 = vrot.slane %v571_v41, 4 }
 0x1a5   : > { %v605_v62 = vrot.slane %v597_v45, 4 }
 0x1a6   : > { %v552_v40 = vpop.permute.xlu0 %551 }
 0x1a7   : > { %v422_v24 = vpop.permute.xlu1 %421  ;;  %v564_v51 = vshrl.u32 %v552_v40, 16 }
 0x1a8   : > { %v433_v27 = vpack.i.b16 %v424_v20, %v422_v24  ;;  %v434_v28 = vshrl.u32 %v422_v24, 16 }
 0x1aa   : > { %v436_v32 = vpack.i.b16 %v435_v26, %v434_v28  ;;  %v446_v33 = vperm.slane %v433_v27, %v1332_v10 }
 0x1ac   : > { %v447_v36 = vrot.slane %v446_v33, 4  ;;  %v450_v37 = vsel %vm316_vm1, %v446_v33, %v449_v30  ;;  %v472_v38 = vperm.slane %v436_v32, %v1332_v10 }
 0x1ad   : > { %v458_v39 = vperm.slane %v450_v37, %v1337_v23 }
 0x1ae   : > { %v448_v42 = vsel %vm316_vm1, %v447_v36, %v441_v21  ;;  %v473_v43 = vrot.slane %v472_v38, 4  ;;  %v476_v44 = vsel %vm316_vm1, %v472_v38, %v475_v35 }
 0x1af   : > { %v454_v46 = vperm.slane %v448_v42, %v1337_v23  ;;  %v461_v47 = vrot.slane %v458_v39, 4  ;;  %v484_v48 = vperm.slane %v476_v44, %v1337_v23  ;;  %v554_v49 = vpop.permute.xlu1 %553 }
 0x1b0   : > { %v474_v50 = vsel %vm316_vm1, %v473_v43, %v467_v25  ;;  %v563_v52 = vpack.i.b16 %v554_v49, %v552_v40  ;;  %v565_v53 = vshrl.u32 %v554_v49, 16 }
 0x1b1   : > { %v459_v54 = vrot.slane %v454_v46, 4  ;;  %v462_v55 = vsel %vm316_vm1, 0, %v461_v47  ;;  %v480_v56 = vperm.slane %v474_v50, %v1337_v23  ;;  %v487_v57 = vrot.slane %v484_v48, 4 }
 0x1b2   : > { %v494_v59 = vrot.slane %v462_v55, 4  ;;  %v566_v60 = vpack.i.b16 %v565_v53, %v564_v51  ;;  %v576_v61 = vperm.slane %v563_v52, %v1332_v10  ;;  %v489_v2 = vsel %vm316_vm1, %v461_v47, %v454_v46 }
 0x1b3   : > { %v460_v63 = vsel %vm316_vm1, 0, %v459_v54  ;;  %v485_v0 = vrot.slane %v480_v56, 4  ;;  %v488_v1 = vsel %vm316_vm1, 0, %v487_v57  ;;  %v508_v8 = vsel %vm316_vm1, %v487_v57, %v480_v56 }
 0x1b4   : > { %v495_v3 = vsel %vm316_vm1, %v494_v59, %v460_v63  ;;  %v513_v4 = vrot.slane %v488_v1, 4  ;;  %v577_v5 = vrot.slane %v576_v61, 4  ;;  %v580_v9 = vsel %vm316_vm1, %v576_v61, %v579_v58 }
 0x1b5   : > { %v486_v6 = vsel %vm316_vm1, 0, %v485_v0  ;;  %v499_v7 = vperm.slane %v495_v3, %v1332_v10  ;;  %v588_v13 = vperm.slane %v580_v9, %v1337_v23  ;;  %v602_v14 = vperm.slane %v566_v60, %v1332_v10 }
 0x1b6   : > { %v514_v11 = vsel %vm316_vm1, %v513_v4, %v486_v6  ;;  %v578_v12 = vsel %vm316_vm1, %v577_v5, %v571_v41  ;;  %v493_v15 = vperm.slane %v489_v2, %v1332_v10  ;;  %v512_v19 = vperm.slane %v508_v8, %v1332_v10 }
 0x1b7   : > { %v500_v16 = vrot.slane %v499_v7, 4  ;;  %v518_v17 = vperm.slane %v514_v11, %v1332_v10  ;;  %v584_v18 = vperm.slane %v578_v12, %v1337_v23  ;;  %v591_v20 = vrot.slane %v588_v13, 4 }
 0x1b8   : > { %v603_v21 = vrot.slane %v602_v14, 4  ;;  %v606_v22 = vsel %vm316_vm1, %v602_v14, %v605_v62 }
 0x1b9   : > { %v501_v24 = vsel %vm316_vm1, %v500_v16, %v493_v15  ;;  %v519_v25 = vrot.slane %v518_v17, 4  ;;  %v589_v26 = vrot.slane %v584_v18, 4  ;;  %v614_v27 = vperm.slane %v606_v22, %v1337_v23 }
 0x1ba   : > { %v505_v28 = vperm.slane %v501_v24, %v1337_v23  ;;  %v592_v29 = vsel %vm316_vm1, 0, %v591_v20  ;;  %v604_v30 = vsel %vm316_vm1, %v603_v21, %v597_v45  ;;  %v619_v46 = vsel %vm316_vm1, %v591_v20, %v584_v18 }
 0x1bb   : > { %v520_v31 = vsel %vm316_vm1, %v519_v25, %v512_v19  ;;  %v610_v32 = vperm.slane %v604_v30, %v1337_v23  ;;  %v617_v33 = vrot.slane %v614_v27, 4  ;;  %v590_v36 = vsel %vm316_vm1, 0, %v589_v26 }
 0x1bc   : > { %v506_v34 = vrot.slane %v505_v28, 4  ;;  %v524_v35 = vperm.slane %v520_v31, %v1337_v23  ;;  %v531_v37 = vshrl.u32 %v505_v28, 16  ;;  %v624_v40 = vrot.slane %v592_v29, 4 }
 0x1bd   : > { %v615_v38 = vrot.slane %v610_v32, 4  ;;  %v618_v39 = vsel %vm316_vm1, 0, %v617_v33  ;;  %v623_v55 = vperm.slane %v619_v46, %v1332_v10  ;;  %v638_v57 = vsel %vm316_vm1, %v617_v33, %v610_v32 }
 0x1be   : > { %v507_v41 = vsel %vm316_vm1, 0, %v506_v34  ;;  %v525_v42 = vrot.slane %v524_v35, 4  ;;  %v529_v43 = vpack.i.b16 %v524_v35, %v505_v28  ;;  %v532_v44 = vshrl.u32 %v524_v35, 16 }
 0x1bf   : > { %v616_v45 = vsel %vm316_vm1, 0, %v615_v38  ;;  %v625_v47 = vsel %vm316_vm1, %v624_v40, %v590_v36  ;;  %v643_v51 = vrot.slane %v618_v39, 4  ;;  %v539_v53 = vshrl.u32 %v507_v41, 16 }
 0x1c0   : > { %v526_v48 = vsel %vm316_vm1, 0, %v525_v42  ;;  %v533_v49 = vpack.i.b16 %v532_v44, %v531_v37  ;;  %v629_v50 = vperm.slane %v625_v47, %v1332_v10  ;;  %543 = vst.msk [vmem:[%s242_s13] sm:$0xf] %vm412_vm2, %v529_v43  ;;  %v642_v63 = vperm.slane %v638_v57, %v1332_v10 }
 0x1c1   : > { %v537_v52 = vpack.i.b16 %v526_v48, %v507_v41  ;;  %v540_v54 = vshrl.u32 %v526_v48, 16  ;;  %v644_v58 = vsel %vm316_vm1, %v643_v51, %v616_v45 }
 0x1c2   : > { %v630_v56 = vrot.slane %v629_v50, 4  ;;  %544 = vst.msk [vmem:[%s242_s13 + $0x4] sm:$0xf] %vm412_vm2, %v533_v49  ;;  %v648_v60 = vperm.slane %v644_v58, %v1332_v10 }
 0x1c3   : > { %v541_v59 = vpack.i.b16 %v540_v54, %v539_v53  ;;  %545 = vst.msk [vmem:[%s242_s13 + $0x8] sm:$0xf] %vm412_vm2, %v537_v52 }
 0x1c4   : > { %v631_v61 = vsel %vm316_vm1, %v630_v56, %v623_v55  ;;  %v649_v0 = vrot.slane %v648_v60, 4 }
 0x1c5   : > { %v635_v62 = vperm.slane %v631_v61, %v1337_v23  ;;  %546 = vst.msk [vmem:[%s242_s13 + $0xc] sm:$0xf] %vm412_vm2, %v541_v59 }
 0x1c6   : > { %1112 = shalt.err (!%p1109_p3)
}
 0x1c7   : > { %927 = dma.vmem_to_hbm [thread:$0]  (%p1285_p13), %s718_s14, 256, %s720_s19, %s1466_s22, %s1545_s27, %s1545_s27, %s1199_s9   ;;  %v636_v10 = vrot.slane %v635_v62, 4  ;;  %v650_v1 = vsel %vm316_vm1, %v649_v0, %v642_v63  ;;  %v661_v3 = vshrl.u32 %v635_v62, 16 }
 0x1c8   : > { %v654_v2 = vperm.slane %v650_v1, %v1337_v23  ;;  %s733_s11 = scalar_lea.hbm %s1536_s4, %s1376_s30  ;;  %s249_s14 = scalar_lea.vmem [#allocation10], %s1365_s26 }
 0x1c9   : > { %v637_v4 = vsel %vm316_vm1, 0, %v636_v10  ;;  %s1490_s13 = sshll.u32 %s733_s11, 4  ;;  %s734_s19 = sshll.u32 %s249_s14, 4  ;;  %s735_s19 = int_to_ptr.vmem [resolvable:$true] %s734_s19  ;;  %s737_s13 = int_to_ptr.hbm [resolvable:$true] %s1490_s13 }
 0x1ca   : > { %v655_v5 = vrot.slane %v654_v2, 4  ;;  %v659_v6 = vpack.i.b16 %v654_v2, %v635_v62  ;;  %v662_v7 = vshrl.u32 %v654_v2, 16  ;;  %v669_v11 = vshrl.u32 %v637_v4, 16  ;;  %s1127_s30 = sshra.s32 %s737_s13, 4  ;;  %s1133_s7 = scalar_lea.hbm %s1536_s4, 32  ;;  %s1128_s30 = int_to_ptr.hbm [resolvable:$true] %s1127_s30 }
 0x1cb   : > { %s1129_s21 = scalar_lea.hbm %s1128_s30, 16  ;;  %p1134_p7 = scmp.lt.s32.totalorder %s1128_s30, %s1536_s4 }
 0x1cc   : > { %v656_v8 = vsel %vm316_vm1, 0, %v655_v5  ;;  %v663_v9 = vpack.i.b16 %v662_v7, %v661_v3  ;;  %673 = vst.msk [vmem:[%s249_s14] sm:$0xf] %vm412_vm2, %v659_v6  ;;  %p1130_p5 = scmp.ne.s32.totalorder %s1128_s30, %s1129_s21  ;;  %p1135_p9 = scmp.lt.s32.totalorder %s1133_s7, %s1129_s21 }
 0x1cd   : > { %v667_v23 = vpack.i.b16 %v656_v8, %v637_v4  ;;  %v670_v12 = vshrl.u32 %v656_v8, 16 }
 0x1ce   : > { %674 = vst.msk [vmem:[%s249_s14 + $0x4] sm:$0xf] %vm412_vm2, %v663_v9  ;;  %p1131_p12 = pnand %p1130_p5, %p1285_p13  ;;  %p1136_p10 = por %p1135_p9, %p1134_p7 }
 0x1cf   : > { %v671_v13 = vpack.i.b16 %v670_v12, %v669_v11  ;;  %675 = vst.msk [vmem:[%s249_s14 + $0x8] sm:$0xf] %vm412_vm2, %v667_v23 }
 0x1d0   : > { %p1132_p8 = pneg %p1131_p12 }
 0x1d1   : > { %676 = vst.msk [vmem:[%s249_s14 + $0xc] sm:$0xf] %vm412_vm2, %v671_v13 }
 0x1d2   : > { %p1137_p11 = pnand %p1136_p10, %p1132_p8 }
 0x1d4   : > { %1140 = shalt.err (!%p1137_p11)
}
 0x1d5   : > { %928 = dma.vmem_to_hbm [thread:$0]  (%p1285_p13), %s735_s19, 256, %s737_s13, %s1466_s22, %s1545_s27, %s1545_s27, %s1199_s9  }
 0x1d6 PF: > { %s751_s25 = sand.u32 1, %s1175_s15   ;;  %p1546_p0 = scmp.ge.s32.totalorder %s1187_s18, 2 }
 0x1d7   : > { %s752_s28 = scalar_lea.sflag [#allocation4], %s751_s25 }
 0x1d8   : > { %p941_p2 = pnand %p1546_p0, %p1292_p4 }
 0x1da   : > { %p942_p6 = pneg %p941_p2 }
 0x1dc   : > { %1166 = dma.done.wait (%p942_p6), %s752_s28, 256  }
 0x1dd   : > { %1168 = vsyncadd (%p942_p6), %s752_s28, 4294967040  ;;  %s1547_s23 = sadd.s32 4294967294, %s1187_s18  }
 0x1de   : > { %s761_s8 = sand.u32 1, %s1547_s23  }
 0x1df   : > { %s762_s12 = scalar_lea.sflag [#allocation9], %s761_s8 }
 0x1e0   : > { %1170 = dma.done.wait (%p942_p6), %s762_s12, 512  }
 0x1e1   : > { %1172 = vsyncadd (%p942_p6), %s762_s12, 4294966784  ;;  %p22_p13 = scmp.ge.s32.totalorder %s1265_s29, 4   ;;  %s1548_s15 = smov %s1179_s16 }
 0x1e2   : > { %s1549_s16 = smov %s1183_s17  ;;  %s1550_s17 = smov %s1277_s6 }
 0x1e3   : > { %s1551_s18 = smov %s1265_s29  ;;  %24 = sbr.rel (!%p22_p13) target bundleno = 8 (0x8), region = 109 }
 0x1e8   :  { %778 = vsyncpa [#allocation3], 1 }
 0x1e9   :  { %780 = vsyncpa [#allocation3 + $0x1], 1 }
 0x1ea   :  { %781 = vsyncpa [#allocation6], 1 }
 0x1eb   :  { %782 = vsyncpa [#allocation4], 1 }
 0x1ec   :  { %784 = vsyncpa [#allocation4 + $0x1], 1 }
 0x1ed   :  { %785 = vsyncpa [#allocation9], 1 }
 0x1ee   :  { %787 = vsyncpa [#allocation9 + $0x1], 1 }

</bundles_post_ra>
